<compile_context>
chip_gen: v6e
topology: v6e:2x2x1
jax: 0.10.0
libtpu: 0.0.40
codegen_flags: <defaults>
</compile_context>

<pallas_src>
import jax
import jax.numpy as jnp
from jax import lax
from jax.experimental import pallas as pl
from jax.experimental.pallas import tpu as pltpu

EMB_DIM = 300            # GloVe 840B-300d dimensionality (fixed by the module)
K_PAD = 384              # 300 padded up to 3 * 128 lanes
TM = 256                 # tokens per grid step
CHUNK = 128              # rows per gather/matmul chunk (2 chunks per step)


def _round_up(x, m):
    return (x + m - 1) // m * m


def _emb_linear_kernel(ids_ref, table_ref, w_ref, b_ref, o_ref, gbuf, sem):
    """ids_ref:   SMEM (N_pad,) int32          (scalar prefetch)
       table_ref: HBM  (V, K_PAD) float32      (memory_space=pl.ANY, DMA-gathered)
       w_ref:     VMEM (K_PAD, DN) bfloat16    (linear weight, pre-transposed, resident)
       b_ref:     VMEM (1, DN) float32         (bias)
       o_ref:     VMEM (TM, DN) float32        (output tile)
       gbuf:      VMEM (2, CHUNK, K_PAD) f32   (double-buffered gather scratch)
       sem:       DMA semaphores (2,)
    """
    i = pl.program_id(0)
    vocab = table_ref.shape[0]
    n_chunks = TM // CHUNK

    def issue(chunk, slot):
        base = i * TM + chunk * CHUNK

        @pl.loop(0, CHUNK)
        def _(j):
            tok = jnp.clip(ids_ref[base + j], 0, vocab - 1)   # guard OOB ids
            pltpu.make_async_copy(
                table_ref.at[tok], gbuf.at[slot, j], sem.at[slot]
            ).start()

    def wait_all(slot):
        @pl.loop(0, CHUNK)
        def _(j):
            # Same-shaped descriptor as the issued copies; one wait per copy.
            pltpu.make_async_copy(
                table_ref.at[0], gbuf.at[slot, 0], sem.at[slot]
            ).wait()

    issue(0, 0)
    for c in range(n_chunks):                 # static, small (2)
        slot = c & 1
        if c + 1 < n_chunks:
            issue(c + 1, 1 - slot)            # overlap next chunk's DMAs
        wait_all(slot)
        e = gbuf[slot].astype(jnp.bfloat16)   # (CHUNK, K_PAD)
        o_ref[pl.ds(c * CHUNK, CHUNK), :] = (
            jnp.dot(e, w_ref[...], preferred_element_type=jnp.float32)
            + b_ref[...]
        ).astype(o_ref.dtype)


@jax.jit
def emb_forward(ids, table, w_t, bias):
    """ids: (B, S) int; table: (V, 300) f32; w_t: (300, d_model); bias: (1, d_model)."""
    B, S = ids.shape
    V, k = table.shape
    d_model = w_t.shape[1]

    dn = _round_up(d_model, 128)
    n = B * S
    n_pad = _round_up(n, TM)

    # Lane/sublane-friendly padding (done here for the demo; pre-pad once in prod).
    table_p = jnp.zeros((V, K_PAD), jnp.float32).at[:, :k].set(table.astype(jnp.float32))
    w_p = jnp.zeros((K_PAD, dn), jnp.float32).at[:k, :d_model].set(w_t.astype(jnp.float32))
    w_p = w_p.astype(jnp.bfloat16)
    b_p = jnp.zeros((1, dn), jnp.float32).at[:, :d_model].set(
        bias.reshape(1, d_model).astype(jnp.float32))
    ids_flat = jnp.zeros((n_pad,), jnp.int32).at[:n].set(ids.reshape(n).astype(jnp.int32))

    out_pad = pl.pallas_call(
        _emb_linear_kernel,
        out_shape=jax.ShapeDtypeStruct((n_pad, dn), jnp.float32),
        grid_spec=pltpu.PrefetchScalarGridSpec(
            num_scalar_prefetch=1,
            grid=(n_pad // TM,),
            in_specs=[
                pl.BlockSpec(memory_space=pl.ANY),                 # table in HBM
                pl.BlockSpec((K_PAD, dn), lambda i, ids: (0, 0)),  # weight resident
                pl.BlockSpec((1, dn), lambda i, ids: (0, 0)),      # bias resident
            ],
            out_specs=pl.BlockSpec((TM, dn), lambda i, ids: (i, 0)),
            scratch_shapes=[
                pltpu.VMEM((2, CHUNK, K_PAD), jnp.float32),
                pltpu.SemaphoreType.DMA((2,)),
            ],
        ),
        compiler_params=pltpu.CompilerParams(
            dimension_semantics=("parallel",),
        ),
    )(ids_flat, table_p, w_p, b_p)

    return out_pad[:n, :d_model].reshape(B, S, d_model)


def make_params(key, vocab, d_model):
    """Deterministic synthetic parameters matching Emb.__init__ shapes."""
    # TODO(synk): StaticEmbedding would load real GloVe-840B-300d vectors;
    # replaced by a synthetic random table here (no file/network access).
    k_tbl, k_w = jax.random.split(key)
    table = jax.random.normal(k_tbl, (vocab, EMB_DIM), dtype=jnp.float32)
    # nn.Linear(300, d_model): weight (d_model, 300) xavier_normal_, bias 0.
    xavier_std = (2.0 / (EMB_DIM + d_model)) ** 0.5
    w = jax.random.normal(k_w, (d_model, EMB_DIM), dtype=jnp.float32) * xavier_std
    bias = jnp.zeros((1, d_model), dtype=jnp.float32)
    return table, w.T, bias  # weight pre-transposed to (300, d_model)


if __name__ == "__main__":
    key = jax.random.PRNGKey(0)
    vocab, d_model = 64, 32
    B, S = 2, 8

    k_params, k_ids = jax.random.split(key)
    table, w_t, bias = make_params(k_params, vocab, d_model)
    ids = jax.random.randint(k_ids, (B, S), 0, vocab, dtype=jnp.int32)

    out = emb_forward(ids, table, w_t, bias)
    out = jax.block_until_ready(out)

    # Reference with matching numerics: gather f32 rows, cast to bf16 like the
    # kernel does, matmul against the bf16 weight with f32 accumulation.
    e = jnp.take(table, ids.reshape(-1), axis=0)
    ref = jnp.dot(
        e.astype(jnp.bfloat16).astype(jnp.float32),
        w_t.astype(jnp.bfloat16).astype(jnp.float32),
        precision=jax.lax.Precision.HIGHEST,
        preferred_element_type=jnp.float32,
    ) + bias
    ref = ref.reshape(B, S, d_model)

    assert out.shape == (B, S, d_model)
    assert jnp.allclose(out, ref, atol=1e-3, rtol=1e-3), float(jnp.max(jnp.abs(out - ref)))

    print("KERNEL_OK")
</pallas_src>

<mosaic_0001>
module attributes {stable_mosaic.version = 11 : i64} {
  func.func @_emb_linear_kernel(%arg0: i32, %arg1: memref<256xi32, #tpu.memory_space<smem>>, %arg2: memref<64x384xf32, #tpu.memory_space<any>>, %arg3: memref<384x128xbf16, #tpu.memory_space<vmem>>, %arg4: memref<1x128xf32, #tpu.memory_space<vmem>>, %arg5: memref<256x128xf32, #tpu.memory_space<vmem>>, %arg6: memref<2x128x384xf32, #tpu.memory_space<vmem>>, %arg7: memref<2x!tpu.dma_semaphore, #tpu.memory_space<semaphore_mem>>) attributes {dimension_semantics = [#tpu.dimension_semantics<parallel>], iteration_bounds = array<i64: 1>, scalar_prefetch = 1 : i64, scratch_operands = 2 : i64, tpu.core_type = #tpu.core_type<tc>, window_params = [{}, {pipeline_mode = #tpu.pipeline_mode<synchronous>, transform_indices = @transform_1, window_bounds = array<i64: 384, 128>}, {pipeline_mode = #tpu.pipeline_mode<synchronous>, transform_indices = @transform_2, window_bounds = array<i64: 1, 128>}, {transform_indices = @transform_3, window_bounds = array<i64: 256, 128>}]} {
    %c256_i32 = arith.constant 256 : i32
    %0 = arith.muli %arg0, %c256_i32 : i32
    %c0_i32 = arith.constant 0 : i32
    %1 = arith.addi %0, %c0_i32 : i32
    %c0_i32_0 = arith.constant 0 : i32
    %c128_i32 = arith.constant 128 : i32
    %2 = arith.addi %c0_i32_0, %c128_i32 : i32
    %c1_i32 = arith.constant 1 : i32
    scf.for %arg8 = %c0_i32_0 to %2 step %c1_i32  : i32 {
      %c1_i32_30 = arith.constant 1 : i32
      %26 = arith.muli %arg8, %c1_i32_30 : i32
      %c0_i32_31 = arith.constant 0 : i32
      %27 = arith.addi %c0_i32_31, %26 : i32
      %28 = arith.addi %1, %27 : i32
      %29 = arith.index_cast %28 : i32 to index
      %30 = memref.load %arg1[%29] : memref<256xi32, #tpu.memory_space<smem>>
      %c0_i32_32 = arith.constant 0 : i32
      %c63_i32 = arith.constant 63 : i32
      %31 = arith.maxsi %c0_i32_32, %30 : i32
      %32 = arith.minsi %c63_i32, %31 : i32
      %c0_i32_33 = arith.constant 0 : i32
      %c0_i32_34 = arith.constant 0 : i32
      %c0_i32_35 = arith.constant 0 : i32
      %33 = tpu.memref_slice %arg2[%32, %c0_i32_35] : memref<64x384xf32, #tpu.memory_space<any>> -> memref<1x384xf32, #tpu.memory_space<any>>
      %34 = tpu.memref_squeeze %33 : memref<1x384xf32, #tpu.memory_space<any>> -> memref<384xf32, #tpu.memory_space<any>>
      %c0_i32_36 = arith.constant 0 : i32
      %35 = tpu.memref_slice %arg6[%c0_i32_33, %27, %c0_i32_36] : memref<2x128x384xf32, #tpu.memory_space<vmem>> -> memref<1x1x384xf32, #tpu.memory_space<vmem>>
      %36 = tpu.memref_squeeze %35 : memref<1x1x384xf32, #tpu.memory_space<vmem>> -> memref<384xf32, #tpu.memory_space<vmem>>
      %37 = tpu.memref_slice %arg7[%c0_i32_34] : memref<2x!tpu.dma_semaphore, #tpu.memory_space<semaphore_mem>> -> memref<1x!tpu.dma_semaphore, #tpu.memory_space<semaphore_mem>>
      %38 = tpu.memref_squeeze %37 : memref<1x!tpu.dma_semaphore, #tpu.memory_space<semaphore_mem>> -> memref<!tpu.dma_semaphore, #tpu.memory_space<semaphore_mem>>
      tpu.enqueue_dma source(%34 : memref<384xf32, #tpu.memory_space<any>>) target(%36 : memref<384xf32, #tpu.memory_space<vmem>>) target_semaphore(%38 : memref<!tpu.dma_semaphore, #tpu.memory_space<semaphore_mem>>)
    }
    %c128_i32_1 = arith.constant 128 : i32
    %c256_i32_2 = arith.constant 256 : i32
    %3 = arith.muli %arg0, %c256_i32_2 : i32
    %c128_i32_3 = arith.constant 128 : i32
    %4 = arith.addi %3, %c128_i32_3 : i32
    %c0_i32_4 = arith.constant 0 : i32
    %c128_i32_5 = arith.constant 128 : i32
    %5 = arith.addi %c0_i32_4, %c128_i32_5 : i32
    %c1_i32_6 = arith.constant 1 : i32
    scf.for %arg8 = %c0_i32_4 to %5 step %c1_i32_6  : i32 {
      %c1_i32_30 = arith.constant 1 : i32
      %26 = arith.muli %arg8, %c1_i32_30 : i32
      %c0_i32_31 = arith.constant 0 : i32
      %27 = arith.addi %c0_i32_31, %26 : i32
      %28 = arith.addi %4, %27 : i32
      %29 = arith.index_cast %28 : i32 to index
      %30 = memref.load %arg1[%29] : memref<256xi32, #tpu.memory_space<smem>>
      %c0_i32_32 = arith.constant 0 : i32
      %c63_i32 = arith.constant 63 : i32
      %31 = arith.maxsi %c0_i32_32, %30 : i32
      %32 = arith.minsi %c63_i32, %31 : i32
      %c1_i32_33 = arith.constant 1 : i32
      %c1_i32_34 = arith.constant 1 : i32
      %c0_i32_35 = arith.constant 0 : i32
      %33 = tpu.memref_slice %arg2[%32, %c0_i32_35] : memref<64x384xf32, #tpu.memory_space<any>> -> memref<1x384xf32, #tpu.memory_space<any>>
      %34 = tpu.memref_squeeze %33 : memref<1x384xf32, #tpu.memory_space<any>> -> memref<384xf32, #tpu.memory_space<any>>
      %c0_i32_36 = arith.constant 0 : i32
      %35 = tpu.memref_slice %arg6[%c1_i32_33, %27, %c0_i32_36] : memref<2x128x384xf32, #tpu.memory_space<vmem>> -> memref<1x1x384xf32, #tpu.memory_space<vmem>>
      %36 = tpu.memref_squeeze %35 : memref<1x1x384xf32, #tpu.memory_space<vmem>> -> memref<384xf32, #tpu.memory_space<vmem>>
      %37 = tpu.memref_slice %arg7[%c1_i32_34] : memref<2x!tpu.dma_semaphore, #tpu.memory_space<semaphore_mem>> -> memref<1x!tpu.dma_semaphore, #tpu.memory_space<semaphore_mem>>
      %38 = tpu.memref_squeeze %37 : memref<1x!tpu.dma_semaphore, #tpu.memory_space<semaphore_mem>> -> memref<!tpu.dma_semaphore, #tpu.memory_space<semaphore_mem>>
      tpu.enqueue_dma source(%34 : memref<384xf32, #tpu.memory_space<any>>) target(%36 : memref<384xf32, #tpu.memory_space<vmem>>) target_semaphore(%38 : memref<!tpu.dma_semaphore, #tpu.memory_space<semaphore_mem>>)
    }
    %c128_i32_7 = arith.constant 128 : i32
    %c0_i32_8 = arith.constant 0 : i32
    %c128_i32_9 = arith.constant 128 : i32
    %6 = arith.addi %c0_i32_8, %c128_i32_9 : i32
    %c1_i32_10 = arith.constant 1 : i32
    scf.for %arg8 = %c0_i32_8 to %6 step %c1_i32_10  : i32 {
      %c0_i32_30 = arith.constant 0 : i32
      %c0_i32_31 = arith.constant 0 : i32
      %c0_i32_32 = arith.constant 0 : i32
      %c0_i32_33 = arith.constant 0 : i32
      %c0_i32_34 = arith.constant 0 : i32
      %26 = tpu.memref_slice %arg2[%c0_i32_30, %c0_i32_34] : memref<64x384xf32, #tpu.memory_space<any>> -> memref<1x384xf32, #tpu.memory_space<any>>
      %27 = tpu.memref_squeeze %26 : memref<1x384xf32, #tpu.memory_space<any>> -> memref<384xf32, #tpu.memory_space<any>>
      %c0_i32_35 = arith.constant 0 : i32
      %28 = tpu.memref_slice %arg6[%c0_i32_31, %c0_i32_32, %c0_i32_35] : memref<2x128x384xf32, #tpu.memory_space<vmem>> -> memref<1x1x384xf32, #tpu.memory_space<vmem>>
      %29 = tpu.memref_squeeze %28 : memref<1x1x384xf32, #tpu.memory_space<vmem>> -> memref<384xf32, #tpu.memory_space<vmem>>
      %30 = tpu.memref_slice %arg7[%c0_i32_33] : memref<2x!tpu.dma_semaphore, #tpu.memory_space<semaphore_mem>> -> memref<1x!tpu.dma_semaphore, #tpu.memory_space<semaphore_mem>>
      %31 = tpu.memref_squeeze %30 : memref<1x!tpu.dma_semaphore, #tpu.memory_space<semaphore_mem>> -> memref<!tpu.dma_semaphore, #tpu.memory_space<semaphore_mem>>
      tpu.wait_dma2 semaphore(%31 : memref<!tpu.dma_semaphore, #tpu.memory_space<semaphore_mem>>) src(%27 : memref<384xf32, #tpu.memory_space<any>>) dst(%29 : memref<384xf32, #tpu.memory_space<vmem>>)
    }
    %c0 = arith.constant 0 : index
    %c0_11 = arith.constant 0 : index
    %c0_12 = arith.constant 0 : index
    %7 = vector.load %arg6[%c0, %c0_11, %c0_12] : memref<2x128x384xf32, #tpu.memory_space<vmem>>, vector<1x128x384xf32>
    %8 = vector.shape_cast %7 : vector<1x128x384xf32> to vector<128x384xf32>
    %9 = arith.truncf %8 : vector<128x384xf32> to vector<128x384xbf16>
    %c0_13 = arith.constant 0 : index
    %c0_14 = arith.constant 0 : index
    %10 = vector.load %arg3[%c0_13, %c0_14] : memref<384x128xbf16, #tpu.memory_space<vmem>>, vector<384x128xbf16>
    %cst = arith.constant dense<0.000000e+00> : vector<128x128xf32>
    %11 = tpu.matmul %9, %10, %cst {dimension_numbers = #tpu.dot_dimension_numbers<[1], [0], [0], [1], [0, 0, 1, 1], [], []>} : vector<128x384xbf16>, vector<384x128xbf16>, vector<128x128xf32> -> vector<128x128xf32>
    %c0_15 = arith.constant 0 : index
    %c0_16 = arith.constant 0 : index
    %12 = vector.load %arg4[%c0_15, %c0_16] : memref<1x128xf32, #tpu.memory_space<vmem>>, vector<1x128xf32>
    %13 = vector.broadcast %12 : vector<1x128xf32> to vector<128x128xf32>
    %14 = arith.addf %11, %13 : vector<128x128xf32>
    %c0_17 = arith.constant 0 : index
    %c0_18 = arith.constant 0 : index
    %15 = vector.load %arg5[%c0_17, %c0_18] : memref<256x128xf32, #tpu.memory_space<vmem>>, vector<128x128xf32>
    tpu.vector_store %arg5[%c0_17, %c0_18], %14 {strides = array<i32>} : memref<256x128xf32, #tpu.memory_space<vmem>>, vector<128x128xf32>,
    %c0_i32_19 = arith.constant 0 : i32
    %c128_i32_20 = arith.constant 128 : i32
    %16 = arith.addi %c0_i32_19, %c128_i32_20 : i32
    %c1_i32_21 = arith.constant 1 : i32
    scf.for %arg8 = %c0_i32_19 to %16 step %c1_i32_21  : i32 {
      %c0_i32_30 = arith.constant 0 : i32
      %c1_i32_31 = arith.constant 1 : i32
      %c0_i32_32 = arith.constant 0 : i32
      %c1_i32_33 = arith.constant 1 : i32
      %c0_i32_34 = arith.constant 0 : i32
      %26 = tpu.memref_slice %arg2[%c0_i32_30, %c0_i32_34] : memref<64x384xf32, #tpu.memory_space<any>> -> memref<1x384xf32, #tpu.memory_space<any>>
      %27 = tpu.memref_squeeze %26 : memref<1x384xf32, #tpu.memory_space<any>> -> memref<384xf32, #tpu.memory_space<any>>
      %c0_i32_35 = arith.constant 0 : i32
      %28 = tpu.memref_slice %arg6[%c1_i32_31, %c0_i32_32, %c0_i32_35] : memref<2x128x384xf32, #tpu.memory_space<vmem>> -> memref<1x1x384xf32, #tpu.memory_space<vmem>>
      %29 = tpu.memref_squeeze %28 : memref<1x1x384xf32, #tpu.memory_space<vmem>> -> memref<384xf32, #tpu.memory_space<vmem>>
      %30 = tpu.memref_slice %arg7[%c1_i32_33] : memref<2x!tpu.dma_semaphore, #tpu.memory_space<semaphore_mem>> -> memref<1x!tpu.dma_semaphore, #tpu.memory_space<semaphore_mem>>
      %31 = tpu.memref_squeeze %30 : memref<1x!tpu.dma_semaphore, #tpu.memory_space<semaphore_mem>> -> memref<!tpu.dma_semaphore, #tpu.memory_space<semaphore_mem>>
      tpu.wait_dma2 semaphore(%31 : memref<!tpu.dma_semaphore, #tpu.memory_space<semaphore_mem>>) src(%27 : memref<384xf32, #tpu.memory_space<any>>) dst(%29 : memref<384xf32, #tpu.memory_space<vmem>>)
    }
    %c1 = arith.constant 1 : index
    %c0_22 = arith.constant 0 : index
    %c0_23 = arith.constant 0 : index
    %17 = vector.load %arg6[%c1, %c0_22, %c0_23] : memref<2x128x384xf32, #tpu.memory_space<vmem>>, vector<1x128x384xf32>
    %18 = vector.shape_cast %17 : vector<1x128x384xf32> to vector<128x384xf32>
    %19 = arith.truncf %18 : vector<128x384xf32> to vector<128x384xbf16>
    %c0_24 = arith.constant 0 : index
    %c0_25 = arith.constant 0 : index
    %20 = vector.load %arg3[%c0_24, %c0_25] : memref<384x128xbf16, #tpu.memory_space<vmem>>, vector<384x128xbf16>
    %cst_26 = arith.constant dense<0.000000e+00> : vector<128x128xf32>
    %21 = tpu.matmul %19, %20, %cst_26 {dimension_numbers = #tpu.dot_dimension_numbers<[1], [0], [0], [1], [0, 0, 1, 1], [], []>} : vector<128x384xbf16>, vector<384x128xbf16>, vector<128x128xf32> -> vector<128x128xf32>
    %c0_27 = arith.constant 0 : index
    %c0_28 = arith.constant 0 : index
    %22 = vector.load %arg4[%c0_27, %c0_28] : memref<1x128xf32, #tpu.memory_space<vmem>>, vector<1x128xf32>
    %23 = vector.broadcast %22 : vector<1x128xf32> to vector<128x128xf32>
    %24 = arith.addf %21, %23 : vector<128x128xf32>
    %c128 = arith.constant 128 : index
    %c0_29 = arith.constant 0 : index
    %25 = vector.load %arg5[%c128, %c0_29] : memref<256x128xf32, #tpu.memory_space<vmem>>, vector<128x128xf32>
    tpu.vector_store %arg5[%c128, %c0_29], %24 {strides = array<i32>} : memref<256x128xf32, #tpu.memory_space<vmem>>, vector<128x128xf32>,
    return
  }
  func.func @transform_1(%arg0: i32, %arg1: memref<256xi32, #tpu.memory_space<smem>>) -> (i32, i32) {
    %c0_i32 = arith.constant 0 : i32
    %c0_i32_0 = arith.constant 0 : i32
    %c0_i32_1 = arith.constant 0 : i32
    return %c0_i32, %c0_i32_0 : i32, i32
  }
  func.func @transform_2(%arg0: i32, %arg1: memref<256xi32, #tpu.memory_space<smem>>) -> (i32, i32) {
    %c0_i32 = arith.constant 0 : i32
    %c0_i32_0 = arith.constant 0 : i32
    %c0_i32_1 = arith.constant 0 : i32
    return %c0_i32, %c0_i32_0 : i32, i32
  }
  func.func @transform_3(%arg0: i32, %arg1: memref<256xi32, #tpu.memory_space<smem>>) -> (i32, i32) {
    %c0_i32 = arith.constant 0 : i32
    %c0_i32_0 = arith.constant 0 : i32
    return %arg0, %c0_i32 : i32, i32
  }
}

</mosaic_0001>

<bundles_post_ra>
// kernel: emb_forward.1
= control target key start
LH: loop header
LB: loop body
LE: loop exit
PB: predicated region body
PF: predicated region fallthrough
CT: control target
= control target key end

     0   :  { %s1976_s0 = inlined_call_operand.vmem [shape: s32[256], index: 0, kind: input, shape index: {}]   ;;  %s1977_s1 = inlined_call_operand.vmem [shape: f32[64,384], index: 1, kind: input, shape index: {}]   ;;  %s1978_s2 = inlined_call_operand.vmem [shape: bf16[384,128], index: 2, kind: input, shape index: {}]   ;;  %s1979_s3 = inlined_call_operand.vmem [shape: f32[1,128], index: 3, kind: input, shape index: {}]   ;;  %s1980_s4 = inlined_call_operand.vmem [shape: f32[256,128], index: 4, kind: output, shape index: {}]  }
   0x1   :  { %s9_s17 = sshll.u32 %s1976_s0, 4  ;;  %s10_s17 = int_to_ptr.vmem [resolvable:$true] %s9_s17 }
   0x2   :  { %s1604_s18 = scalar_lea.vmem %s10_s17, 32  ;;  %p1609_p1 = scmp.lt.s32.totalorder %s10_s17, %s10_s17 }
   0x3   :  { %p1605_p0 = scmp.ne.s32.totalorder %s10_s17, %s1604_s18  ;;  %p1610_p2 = scmp.lt.s32.totalorder %s1604_s18, %s1604_s18 }
   0x5   :  { %p1611_p3 = por %p1610_p2, %p1609_p1 }
   0x7   :  { %p1612_p4 = pnand %p1611_p3, %p1605_p0 }
   0x9   :  { %1615 = shalt.err (!%p1612_p4)  }
   0xa   :  { %s1654_s19 = smov [#allocation5]  }
   0xb   :  { %12 = dma.vmem_to_smem %s10_s17, 32, %s1654_s19, [#allocation4] }
   0xc   :  { %1632 = dma.done.wait [#allocation4], 32 }
   0xd   :  { %1633 = vsyncadd [#allocation4], 4294967264 }
   0xe   :  { %14 = sfence }
   0xf   :  { %s1638_s20 = smov 0  }
  0x10 LB: > { %s28_s21 = sld [smem:[#allocation5 + %s1640_s20]]  ;;  %s38_s22 = sshrl.u32 %s1640_s20, 3  ;;  %s1640_s20 = sphi %s1638_s20, %s26_s20  }
  0x11   : > { %s39_s0 = sand.u32 7, %s1640_s20   ;;  %s40_s23 = smul.u32 24, %s38_s22 }
  0x13   : > { %s41_s24 = sadd.s32 %s40_s23, %s39_s0 }
  0x14   : > { %s42_s6 = scalar_lea.vmem [#allocation2], %s41_s24 }
  0x16   : > { %p29_p5 = scmp.gt.s32.totalorder %s28_s21, 0  ;;  %p1227_p6 = scmp.lt.s32.totalorder %s28_s21, 63 }
  0x18   : > { %s1982_s21 = smov (!%p29_p5, %s28_s21), 0 }
  0x19   : > { %s1984_s21 = smov (!%p1227_p6, %s1982_s21), 63 }
  0x1a   : > { %s33_s25 = sshrl.u32 %s1984_s21, 3  ;;  %s34_s26 = sand.u32 7, %s1984_s21  }
  0x1b   : > { %s35_s27 = smul.u32 24, %s33_s25 }
  0x1d   : > { %s36_s28 = sadd.s32 %s35_s27, %s34_s26 }
  0x1e   : > { %s37_s5 = scalar_lea.vmem %s1977_s1, %s36_s28 }
  0x1f   : > { %v61_v0 = vld [vmem:[%s37_s5] sm:$0x1]  ;;  %v63_v1 = vld [vmem:[%s37_s5 + $0x8] sm:$0x1]  ;;  %v65_v2 = vld [vmem:[%s37_s5 + $0x10] sm:$0x1] }
  0x20   : > { %62 = vst [vmem:[%s42_s6] sm:$0x1] %v61_v0  ;;  %64 = vst [vmem:[%s42_s6 + $0x8] sm:$0x1] %v63_v1 }
  0x21   : > { %66 = vst [vmem:[%s42_s6 + $0x10] sm:$0x1] %v65_v2 }
  0x22   : > { %96 = vsyncadd [#allocation3], 48  ;;  %s26_s20 = sadd.s32 1, %s1640_s20  }
  0x23   : > { %p23_p7 = scmp.ge.s32.totalorder %s26_s20, 128  }
  0x24   :  { %s1686_s7 = smov (%p23_p7), 0  }
  0x25   :  { %25 = sbr.rel (!%p23_p7) target bundleno = 16 (0x10), region = 144 }
  0x2a LB: > { %s104_s8 = sadd.s32 128, %s1644_s7  ;;  %s115_s10 = sshrl.u32 %s1644_s7, 3  ;;  %s1644_s7 = sphi %s1686_s7, %s103_s7  }
  0x2b   : > { %s105_s9 = sld [smem:[#allocation5 + %s104_s8]]  ;;  %s116_s11 = sand.u32 7, %s1644_s7  }
  0x2c   : > { %s1184_s12 = smul.u32 24, %s115_s10 }
  0x2e   : > { %s1185_s13 = sadd.s32 %s1184_s12, %s116_s11 }
  0x2f   : > { %s1186_s21 = scalar_lea.vmem [#allocation2], %s1185_s13 }
  0x31   : > { %p106_p8 = scmp.gt.s32.totalorder %s105_s9, 0  ;;  %p1232_p9 = scmp.lt.s32.totalorder %s105_s9, 63 }
  0x33   : > { %s1986_s9 = smov (!%p106_p8, %s105_s9), 0 }
  0x34   : > { %s1988_s9 = smov (!%p1232_p9, %s1986_s9), 63 }
  0x35   : > { %s110_s14 = sshrl.u32 %s1988_s9, 3  ;;  %s111_s15 = sand.u32 7, %s1988_s9  }
  0x36   : > { %s112_s16 = smul.u32 24, %s110_s14 }
  0x38   : > { %s113_s17 = sadd.s32 %s112_s16, %s111_s15 }
  0x39   : > { %s114_s20 = scalar_lea.vmem %s1977_s1, %s113_s17 }
  0x3a   : > { %v140_v3 = vld [vmem:[%s114_s20] sm:$0x1]  ;;  %v142_v4 = vld [vmem:[%s114_s20 + $0x8] sm:$0x1]  ;;  %v144_v5 = vld [vmem:[%s114_s20 + $0x10] sm:$0x1] }
  0x3b   : > { %1240 = vst [vmem:[%s1186_s21 + $0x180] sm:$0x1] %v140_v3  ;;  %1241 = vst [vmem:[%s1186_s21 + $0x188] sm:$0x1] %v142_v4 }
  0x3c   : > { %1242 = vst [vmem:[%s1186_s21 + $0x190] sm:$0x1] %v144_v5 }
  0x3d   : > { %175 = vsyncadd [#allocation3 + $0x1], 48  ;;  %s103_s7 = sadd.s32 1, %s1644_s7  }
  0x3e   : > { %p100_p10 = scmp.ge.s32.totalorder %s103_s7, 128  }
  0x3f   :  { %s1646_s22 = smov (%p100_p10), 0  }
  0x40   :  { %102 = sbr.rel (!%p100_p10) target bundleno = 42 (0x2a), region = 155 }
  0x45 LB: > { %1634 = dma.done.wait [#allocation3], 48  ;;  %s1648_s22 = sphi %s1646_s22, %s181_s22  }
  0x46   : > { %1635 = vsyncadd [#allocation3], 4294967248  ;;  %s181_s22 = sadd.s32 1, %s1648_s22  }
  0x47   : > { %p178_p11 = scmp.ge.s32.totalorder %s181_s22, 128  }
  0x48   :  { %v1556_v6 = vld [vmem:[%s1978_s2 + $0x78] sm:$0xff] (%p178_p11)   ;;  %v1558_v8 = vld [vmem:[%s1978_s2 + $0x70] sm:$0xff] (%p178_p11)   ;;  %v1561_v11 = vld [vmem:[%s1978_s2 + $0x68] sm:$0xff] (%p178_p11)   ;;  %s1650_s21 = smov (%p178_p11), 0  }
  0x49   :  { %180 = sbr.rel (!%p178_p11) target bundleno = 69 (0x45), region = 166  ;;  %v1557_v7 = vld [vmem:[%s1978_s2 + $0x38] sm:$0xff] (%p178_p11)   ;;  %1299 = vmatprep.subr.bf16.mxu0 (%p178_p11), %v1556_v6  ;;  %v1560_v10 = vld [vmem:[%s1978_s2 + $0x30] sm:$0xff] (%p178_p11)   ;;  %v1563_v13 = vld [vmem:[%s1978_s2 + $0x28] sm:$0xff] (%p178_p11)  }
  0x4a   :  { %1300 = vmatpush3.bf16.msra.mxu0 (%p178_p11), %v1557_v7  ;;  %v1559_v9 = vld [vmem:[%s1978_s2 + $0xb8] sm:$0xff] (%p178_p11)   ;;  %v1562_v12 = vld [vmem:[%s1978_s2 + $0xb0] sm:$0xff] (%p178_p11)   ;;  %v1564_v14 = vld [vmem:[%s1978_s2 + $0x60] sm:$0xff] (%p178_p11)  }
  0x4b   :  { %1301 = vmatprep.subr.bf16.mxu0 (%p178_p11), %v1558_v8  ;;  %1459 = vmatprep.subr.bf16.mxu1 (%p178_p11), %v1559_v9  ;;  %v1565_v15 = vld [vmem:[%s1978_s2 + $0xa8] sm:$0xff] (%p178_p11)   ;;  %v1566_v16 = vld [vmem:[%s1978_s2 + $0x20] sm:$0xff] (%p178_p11)   ;;  %v1567_v17 = vld [vmem:[%s1978_s2 + $0x58] sm:$0xff] (%p178_p11)  }
  0x4c   :  { %1460 = vmatpush3.bf16.msra.mxu1 (%p178_p11), %v1559_v9  ;;  %v1568_v18 = vld [vmem:[%s1978_s2 + $0xa0] sm:$0xff] (%p178_p11)   ;;  %v1569_v19 = vld [vmem:[%s1978_s2 + $0x18] sm:$0xff] (%p178_p11)   ;;  %v1570_v21 = vld [vmem:[%s1978_s2 + $0x50] sm:$0xff] (%p178_p11)  }
  0x4d   :  { %1461 = vmatprep.subr.bf16.mxu1 (%p178_p11), %v1562_v12  ;;  %v1571_v20 = vld [vmem:[%s1978_s2 + $0x98] sm:$0xff] (%p178_p11)   ;;  %v1572_v22 = vld [vmem:[%s1978_s2 + $0x10] sm:$0xff] (%p178_p11)   ;;  %v1573_v24 = vld [vmem:[%s1978_s2 + $0x48] sm:$0xff] (%p178_p11)  }
  0x4e   :  { %1302 = vmatpush3.bf16.msra.mxu0 %v1560_v10  ;;  %v1574_v23 = vld [vmem:[%s1978_s2 + $0x90] sm:$0xff]   ;;  %v1575_v25 = vld [vmem:[%s1978_s2 + $0x8] sm:$0xff]   ;;  %v188_v28 = vld [vmem:[#allocation2 + $0x20] sm:$0xff] }
  0x4f   :  { %1303 = vmatprep.subr.bf16.mxu0 %v1561_v11  ;;  %v1577_v26 = vld [vmem:[%s1978_s2 + $0x88] sm:$0xff]   ;;  %v1576_v29 = vld [vmem:[%s1978_s2 + $0x40] sm:$0xff]   ;;  %v186_v31 = vld [vmem:[#allocation2 + $0x10] sm:$0xff] }
  0x50   :  { %1462 = vmatpush3.bf16.msra.mxu1 %v1562_v12  ;;  %v185_v27 = vld [vmem:[#allocation2 + $0x8] sm:$0xff]  ;;  %v1578_v33 = vld [vmem:[%s1978_s2] sm:$0xff]   ;;  %v187_v36 = vld [vmem:[#allocation2 + $0x18] sm:$0xff] }
  0x51   :  { %1463 = vmatprep.subr.bf16.mxu1 %v1565_v15  ;;  %v233_v30 = vpack.c.bf16 %v188_v28, %v185_v27  ;;  %v189_v32 = vld [vmem:[#allocation2 + $0x28] sm:$0xff]  ;;  %v184_v35 = vld [vmem:[#allocation2] sm:$0xff]  ;;  %v191_v38 = vld [vmem:[#allocation2 + $0x38] sm:$0xff] }
  0x52   :  { %1304 = vmatpush3.bf16.msra.mxu0 %v1563_v13  ;;  %v234_v34 = vpack.c.bf16 %v189_v32, %v186_v31  ;;  %v1579_v37 = vld [vmem:[%s1978_s2 + $0x80] sm:$0xff]   ;;  %v194_v39 = vld [vmem:[#allocation2 + $0x50] sm:$0xff]  ;;  %v232_v40 = vpack.c.bf16 %v187_v36, %v184_v35  ;;  %v195_v42 = vld [vmem:[#allocation2 + $0x58] sm:$0xff] }
  0x53   :  { %1305 = vmatprep.subr.bf16.mxu0 %v1564_v14  ;;  %487 = vmatprep.mubr.bf16.mxu0 %v233_v30  ;;  %v192_v41 = vld [vmem:[#allocation2 + $0x40] sm:$0xff]  ;;  %v236_v43 = vpack.c.bf16 %v194_v39, %v191_v38  ;;  %v198_v44 = vld [vmem:[#allocation2 + $0x70] sm:$0xff]  ;;  %v201_v45 = vld [vmem:[#allocation2 + $0x88] sm:$0xff] }
  0x54   :  { %1464 = vmatpush3.bf16.msra.mxu1 %v1565_v15  ;;  %1475 = vmatprep.mubr.bf16.mxu1 %v234_v34  ;;  %v237_v46 = vpack.c.bf16 %v195_v42, %v192_v41  ;;  %v240_v47 = vpack.c.bf16 %v201_v45, %v198_v44  ;;  %v190_v48 = vld [vmem:[#allocation2 + $0x30] sm:$0xff]  ;;  %v193_v49 = vld [vmem:[#allocation2 + $0x48] sm:$0xff]  ;;  %v200_v51 = vld [vmem:[#allocation2 + $0x80] sm:$0xff] }
  0x55   :  { %1465 = vmatprep.subr.bf16.mxu1 %v1568_v18  ;;  %v197_v50 = vld [vmem:[#allocation2 + $0x68] sm:$0xff]  ;;  %v235_v52 = vpack.c.bf16 %v193_v49, %v190_v48  ;;  %v204_v53 = vld [vmem:[#allocation2 + $0xa0] sm:$0xff]  ;;  %v207_v54 = vld [vmem:[#allocation2 + $0xb8] sm:$0xff] }
  0x56   :  { %1306 = vmatpush3.bf16.msra.mxu0 %v1566_v16  ;;  %v239_v55 = vpack.c.bf16 %v200_v51, %v197_v50  ;;  %v210_v56 = vld [vmem:[#allocation2 + $0xd0] sm:$0xff]  ;;  %v213_v57 = vld [vmem:[#allocation2 + $0xe8] sm:$0xff]  ;;  %v243_v58 = vpack.c.bf16 %v207_v54, %v204_v53  ;;  %v196_v60 = vld [vmem:[#allocation2 + $0x60] sm:$0xff] }
  0x57   :  { %1307 = vmatprep.subr.bf16.mxu0 %v1567_v17  ;;  %v246_v59 = vpack.c.bf16 %v213_v57, %v210_v56  ;;  %v199_v61 = vld [vmem:[#allocation2 + $0x78] sm:$0xff]  ;;  %v206_v63 = vld [vmem:[#allocation2 + $0xb0] sm:$0xff]  ;;  %v216_v1 = vld [vmem:[#allocation2 + $0x100] sm:$0xff] }
  0x58   :  { %1466 = vmatpush3.bf16.msra.mxu1 %v1568_v18  ;;  %v203_v62 = vld [vmem:[#allocation2 + $0x98] sm:$0xff]  ;;  %v238_v0 = vpack.c.bf16 %v199_v61, %v196_v60  ;;  %v222_v4 = vld [vmem:[#allocation2 + $0x130] sm:$0xff]  ;;  %v225_v5 = vld [vmem:[#allocation2 + $0x148] sm:$0xff] }
  0x59   :  { %1467 = vmatprep.subr.bf16.mxu1 %v1571_v20  ;;  %v219_v2 = vld [vmem:[#allocation2 + $0x118] sm:$0xff]  ;;  %v242_v3 = vpack.c.bf16 %v206_v63, %v203_v62  ;;  %v252_v7 = vpack.c.bf16 %v225_v5, %v222_v4  ;;  %v202_v8 = vld [vmem:[#allocation2 + $0x90] sm:$0xff]  ;;  %v205_v9 = vld [vmem:[#allocation2 + $0xa8] sm:$0xff] }
  0x5a   :  { %1308 = vmatpush3.bf16.msra.mxu0 %v1569_v19  ;;  %v249_v6 = vpack.c.bf16 %v219_v2, %v216_v1  ;;  %v209_v10 = vld [vmem:[#allocation2 + $0xc8] sm:$0xff]  ;;  %v212_v11 = vld [vmem:[#allocation2 + $0xe0] sm:$0xff]  ;;  %v241_v12 = vpack.c.bf16 %v205_v9, %v202_v8  ;;  %v231_v14 = vld [vmem:[#allocation2 + $0x178] sm:$0xff] }
  0x5b   :  { %1309 = vmatprep.subr.bf16.mxu0 %v1570_v21  ;;  %v228_v13 = vld [vmem:[#allocation2 + $0x160] sm:$0xff]  ;;  %v245_v15 = vpack.c.bf16 %v212_v11, %v209_v10  ;;  %v211_v18 = vld [vmem:[#allocation2 + $0xd8] sm:$0xff]  ;;  %v230_v32 = vld [vmem:[#allocation2 + $0x170] sm:$0xff] }
  0x5c   :  { %1468 = vmatpush3.bf16.msra.mxu1 %v1571_v20  ;;  %v255_v16 = vpack.c.bf16 %v231_v14, %v228_v13  ;;  %v208_v17 = vld [vmem:[#allocation2 + $0xc0] sm:$0xff]  ;;  %v215_v19 = vld [vmem:[#allocation2 + $0xf8] sm:$0xff]  ;;  %v218_v20 = vld [vmem:[#allocation2 + $0x110] sm:$0xff] }
  0x5d   :  { %1469 = vmatprep.subr.bf16.mxu1 %v1574_v23  ;;  %v244_v21 = vpack.c.bf16 %v211_v18, %v208_v17  ;;  %v223_v30 = vld [vmem:[#allocation2 + $0x138] sm:$0xff]  ;;  %v226_v35 = vld [vmem:[#allocation2 + $0x150] sm:$0xff]  ;;  %v229_v36 = vld [vmem:[#allocation2 + $0x168] sm:$0xff] }
  0x5e   :  { %1310 = vmatpush3.bf16.msra.mxu0 %v1572_v22  ;;  %v248_v22 = vpack.c.bf16 %v218_v20, %v215_v19  ;;  %v227_v31 = vld [vmem:[#allocation2 + $0x158] sm:$0xff] }
  0x5f   :  { %1311 = vmatprep.subr.bf16.mxu0 %v1573_v24  ;;  %v217_v24 = vld [vmem:[#allocation2 + $0x108] sm:$0xff]  ;;  %v254_v34 = vpack.c.bf16 %v230_v32, %v227_v31 }
  0x60   :  { %1470 = vmatpush3.bf16.msra.mxu1 %v1574_v23  ;;  %v214_v23 = vld [vmem:[#allocation2 + $0xf0] sm:$0xff] }
  0x61   :  { %1471 = vmatprep.subr.bf16.mxu1 %v1577_v26  ;;  %v247_v27 = vpack.c.bf16 %v217_v24, %v214_v23 }
  0x62   :  { %1312 = vmatpush3.bf16.msra.mxu0 %v1575_v25  ;;  %v221_v25 = vld [vmem:[#allocation2 + $0x128] sm:$0xff] }
  0x63   :  { %1313 = vmatprep.subr.bf16.mxu0 %v1576_v29  ;;  %v220_v29 = vld [vmem:[#allocation2 + $0x120] sm:$0xff] }
  0x64   :  { %1472 = vmatpush3.bf16.msra.mxu1 %v1577_v26  ;;  %v224_v26 = vld [vmem:[#allocation2 + $0x140] sm:$0xff] }
  0x65   :  { %1473 = vmatprep.subr.bf16.mxu1 %v1579_v37  ;;  %v251_v28 = vpack.c.bf16 %v224_v26, %v221_v25 }
  0x66   :  { %1314 = vmatpush3.bf16.msra.mxu0 %v1578_v33  ;;  %v250_v33 = vpack.c.bf16 %v223_v30, %v220_v29 }
  0x68   :  { %1474 = vmatpush3.bf16.msra.mxu1 %v1579_v37  ;;  %v253_v37 = vpack.c.bf16 %v229_v36, %v226_v35 }
  0x69   :  { %488 = vmatmul.mubr.bf16.vlgmr.msra.gmra.mxu0 %v232_v40  ;;  %v1769_v40 = vld [vmem:[%s1979_s3] ss:$0 sm:$0xff] }
  0x6a   :  { %495 = vmatprep.mubr.bf16.mxu0 %v236_v43 }
  0x6b   :  { %1476 = vmatmul.mubr.bf16.vlgmr.msra.gmra.mxu1 %v237_v46 }
  0x6c   :  { %1479 = vmatprep.mubr.bf16.mxu1 %v240_v47 }
  0x71   :  { %496 = vmatmul.mubr.bf16.gmra.mxu0 %v235_v52 }
  0x72   :  { %503 = vmatprep.mubr.bf16.mxu0 %v239_v55 }
  0x73   :  { %1480 = vmatmul.mubr.bf16.gmra.mxu1 %v243_v58 }
  0x74   :  { %1483 = vmatprep.mubr.bf16.mxu1 %v246_v59 }
  0x79   :  { %504 = vmatmul.mubr.bf16.gmra.mxu0 %v238_v0 }
  0x7a   :  { %511 = vmatprep.mubr.bf16.mxu0 %v242_v3 }
  0x7b   :  { %1484 = vmatmul.mubr.bf16.gmra.mxu1 %v249_v6 }
  0x7c   :  { %1487 = vmatprep.mubr.bf16.mxu1 %v252_v7 }
  0x81   :  { %512 = vmatmul.mubr.bf16.gmra.mxu0 %v241_v12 }
  0x82   :  { %519 = vmatprep.mubr.bf16.mxu0 %v245_v15 }
  0x83   :  { %1488 = vmatmul.mubr.bf16.gmra.mxu1 %v255_v16 }
  0x89   :  { %520 = vmatmul.mubr.bf16.gmra.mxu0 %v244_v21 }
  0x8a   :  { %527 = vmatprep.mubr.bf16.mxu0 %v248_v22 }
  0x91   :  { %528 = vmatmul.mubr.bf16.gmra.mxu0 %v247_v27 }
  0x92   :  { %535 = vmatprep.mubr.bf16.mxu0 %v251_v28 }
  0x99   :  { %536 = vmatmul.mubr.bf16.gmra.mxu0 %v250_v33 }
  0x9a   :  { %543 = vmatprep.mubr.bf16.mxu0 %v254_v34 }
  0xa1   :  { %544 = vmatmul.mubr.bf16.gmra.mxu0 %v253_v37 }
 0x129   :  { %v1315_v38 = vpop.f32.mrf.mxu0 }
 0x12b   :  { %v1316_v39 = vpop.f32.mrf.mxu0  ;;  %v1477_v42 = vpop.f32.mrf.mxu1 }
 0x12c   :  { %v1317_v41 = vadd.f32 %v1316_v39, %v1315_v38 }
 0x12d   :  { %v1318_v43 = vpop.f32.mrf.mxu0  ;;  %v586_v45 = vpop.f32.mrf.mxu1 }
 0x12e   :  { %v490_v44 = vadd.f32 %v1317_v41, %v1769_v40 }
 0x12f   :  { %v1319_v46 = vpop.f32.mrf.mxu0  ;;  %v1478_v49 = vpop.f32.mrf.mxu1 }
 0x130   :  { %v1320_v47 = vadd.f32 %v1319_v46, %v1318_v43  ;;  %v587_v48 = vadd.f32 %v586_v45, %v490_v44 }
 0x131   :  { %v1321_v50 = vpop.f32.mrf.mxu0  ;;  %v589_v52 = vpop.f32.mrf.mxu1 }
 0x132   :  { %649 = vst [vmem:[%s1980_s4] sm:$0xff] %v587_v48  ;;  %v493_v51 = vadd.f32 %v1320_v47, %v1769_v40 }
 0x133   :  { %v1322_v53 = vpop.f32.mrf.mxu0  ;;  %v1481_v57 = vpop.f32.mrf.mxu1 }
 0x134   :  { %v1323_v54 = vadd.f32 %v1322_v53, %v1321_v50  ;;  %v590_v55 = vadd.f32 %v589_v52, %v493_v51 }
 0x135   :  { %v1324_v56 = vpop.f32.mrf.mxu0  ;;  %v602_v63 = vpop.f32.mrf.mxu1 }
 0x136   :  { %v498_v58 = vadd.f32 %v1323_v54, %v1769_v40  ;;  %650 = vst [vmem:[%s1980_s4 + $0x8] sm:$0xff] %v590_v55 }
 0x137   :  { %v1325_v59 = vpop.f32.mrf.mxu0  ;;  %v1482_v5 = vpop.f32.mrf.mxu1 }
 0x138   :  { %v595_v60 = vadd.f32 %v1477_v42, %v498_v58  ;;  %v1326_v61 = vadd.f32 %v1325_v59, %v1324_v56 }
 0x139   :  { %v1327_v62 = vpop.f32.mrf.mxu0  ;;  %v605_v11 = vpop.f32.mrf.mxu1 }
 0x13a   :  { %651 = vst [vmem:[%s1980_s4 + $0x10] sm:$0xff] %v595_v60  ;;  %v501_v0 = vadd.f32 %v1326_v61, %v1769_v40 }
 0x13b   :  { %v1328_v1 = vpop.f32.mrf.mxu0  ;;  %v1485_v17 = vpop.f32.mrf.mxu1 }
 0x13c   :  { %v598_v2 = vadd.f32 %v1478_v49, %v501_v0  ;;  %v1329_v3 = vadd.f32 %v1328_v1, %v1327_v62 }
 0x13d   :  { %v1330_v4 = vpop.f32.mrf.mxu0  ;;  %v618_v23 = vpop.f32.mrf.mxu1 }
 0x13e   :  { %652 = vst [vmem:[%s1980_s4 + $0x18] sm:$0xff] %v598_v2  ;;  %v506_v6 = vadd.f32 %v1329_v3, %v1769_v40 }
 0x13f   :  { %v1331_v7 = vpop.f32.mrf.mxu0  ;;  %v1486_v29 = vpop.f32.mrf.mxu1 }
 0x140   :  { %v1332_v8 = vadd.f32 %v1331_v7, %v1330_v4  ;;  %v603_v9 = vadd.f32 %v602_v63, %v506_v6 }
 0x141   :  { %v1333_v10 = vpop.f32.mrf.mxu0  ;;  %v621_v35 = vpop.f32.mrf.mxu1 }
 0x142   :  { %653 = vst [vmem:[%s1980_s4 + $0x20] sm:$0xff] %v603_v9  ;;  %v509_v12 = vadd.f32 %v1332_v8, %v1769_v40 }
 0x143   :  { %v1334_v13 = vpop.f32.mrf.mxu0  ;;  %v1489_v42 = vpop.f32.mrf.mxu1 }
 0x144   :  { %v1335_v14 = vadd.f32 %v1334_v13, %v1333_v10  ;;  %v606_v15 = vadd.f32 %v605_v11, %v509_v12 }
 0x145   :  { %v1336_v16 = vpop.f32.mrf.mxu0  ;;  %v634_v48 = vpop.f32.mrf.mxu1 }
 0x146   :  { %v514_v18 = vadd.f32 %v1335_v14, %v1769_v40  ;;  %654 = vst [vmem:[%s1980_s4 + $0x28] sm:$0xff] %v606_v15 }
 0x147   :  { %v1337_v19 = vpop.f32.mrf.mxu0  ;;  %v1490_v54 = vpop.f32.mrf.mxu1 }
 0x148   :  { %v611_v20 = vadd.f32 %v1481_v57, %v514_v18  ;;  %v1338_v21 = vadd.f32 %v1337_v19, %v1336_v16 }
 0x149   :  { %v1339_v22 = vpop.f32.mrf.mxu0  ;;  %v637_v60 = vpop.f32.mrf.mxu1 }
 0x14a   :  { %655 = vst [vmem:[%s1980_s4 + $0x30] sm:$0xff] %v611_v20  ;;  %v517_v24 = vadd.f32 %v1338_v21, %v1769_v40 }
 0x14b   :  { %v1340_v25 = vpop.f32.mrf.mxu0 }
 0x14c   :  { %v614_v26 = vadd.f32 %v1482_v5, %v517_v24  ;;  %v1341_v27 = vadd.f32 %v1340_v25, %v1339_v22 }
 0x14d   :  { %v1342_v28 = vpop.f32.mrf.mxu0 }
 0x14e   :  { %656 = vst [vmem:[%s1980_s4 + $0x38] sm:$0xff] %v614_v26  ;;  %v522_v30 = vadd.f32 %v1341_v27, %v1769_v40 }
 0x14f   :  { %v1343_v31 = vpop.f32.mrf.mxu0 }
 0x150   :  { %v1344_v32 = vadd.f32 %v1343_v31, %v1342_v28  ;;  %v619_v33 = vadd.f32 %v618_v23, %v522_v30 }
 0x151   :  { %v1345_v34 = vpop.f32.mrf.mxu0 }
 0x152   :  { %657 = vst [vmem:[%s1980_s4 + $0x40] sm:$0xff] %v619_v33  ;;  %v525_v36 = vadd.f32 %v1344_v32, %v1769_v40 }
 0x153   :  { %v1346_v37 = vpop.f32.mrf.mxu0 }
 0x154   :  { %v1347_v38 = vadd.f32 %v1346_v37, %v1345_v34  ;;  %v622_v39 = vadd.f32 %v621_v35, %v525_v36 }
 0x155   :  { %v1348_v41 = vpop.f32.mrf.mxu0 }
 0x156   :  { %v530_v43 = vadd.f32 %v1347_v38, %v1769_v40  ;;  %658 = vst [vmem:[%s1980_s4 + $0x48] sm:$0xff] %v622_v39 }
 0x157   :  { %v1349_v44 = vpop.f32.mrf.mxu0 }
 0x158   :  { %v627_v45 = vadd.f32 %v1485_v17, %v530_v43  ;;  %v1350_v46 = vadd.f32 %v1349_v44, %v1348_v41 }
 0x159   :  { %v1351_v47 = vpop.f32.mrf.mxu0 }
 0x15a   :  { %659 = vst [vmem:[%s1980_s4 + $0x50] sm:$0xff] %v627_v45  ;;  %v533_v49 = vadd.f32 %v1350_v46, %v1769_v40 }
 0x15b   :  { %v1352_v50 = vpop.f32.mrf.mxu0 }
 0x15c   :  { %v630_v51 = vadd.f32 %v1486_v29, %v533_v49  ;;  %v1353_v52 = vadd.f32 %v1352_v50, %v1351_v47 }
 0x15d   :  { %v1354_v53 = vpop.f32.mrf.mxu0 }
 0x15e   :  { %660 = vst [vmem:[%s1980_s4 + $0x58] sm:$0xff] %v630_v51  ;;  %v538_v55 = vadd.f32 %v1353_v52, %v1769_v40 }
 0x15f   :  { %v1355_v56 = vpop.f32.mrf.mxu0 }
 0x160   :  { %v1356_v57 = vadd.f32 %v1355_v56, %v1354_v53  ;;  %v635_v58 = vadd.f32 %v634_v48, %v538_v55 }
 0x161   :  { %v1357_v59 = vpop.f32.mrf.mxu0 }
 0x162   :  { %661 = vst [vmem:[%s1980_s4 + $0x60] sm:$0xff] %v635_v58  ;;  %v541_v61 = vadd.f32 %v1356_v57, %v1769_v40 }
 0x163   :  { %v1358_v62 = vpop.f32.mrf.mxu0 }
 0x164   :  { %v1359_v63 = vadd.f32 %v1358_v62, %v1357_v59  ;;  %v638_v0 = vadd.f32 %v637_v60, %v541_v61 }
 0x165   :  { %v1360_v1 = vpop.f32.mrf.mxu0 }
 0x166   :  { %v546_v2 = vadd.f32 %v1359_v63, %v1769_v40  ;;  %662 = vst [vmem:[%s1980_s4 + $0x68] sm:$0xff] %v638_v0 }
 0x167   :  { %v1361_v3 = vpop.f32.mrf.mxu0 }
 0x168   :  { %v643_v4 = vadd.f32 %v1489_v42, %v546_v2  ;;  %v1362_v5 = vadd.f32 %v1361_v3, %v1360_v1 }
 0x16a   :  { %663 = vst [vmem:[%s1980_s4 + $0x70] sm:$0xff] %v643_v4  ;;  %v549_v6 = vadd.f32 %v1362_v5, %v1769_v40 }
 0x16c   :  { %v646_v7 = vadd.f32 %v1490_v54, %v549_v6 }
 0x16e   :  { %664 = vst [vmem:[%s1980_s4 + $0x78] sm:$0xff] %v646_v7 }
 0x16f LB: > { %1636 = dma.done.wait [#allocation3 + $0x1], 48  ;;  %s1652_s21 = sphi %s1650_s21, %s670_s21  }
 0x170   : > { %1637 = vsyncadd [#allocation3 + $0x1], 4294967248  ;;  %s670_s21 = sadd.s32 1, %s1652_s21  }
 0x171   : > { %p667_p12 = scmp.ge.s32.totalorder %s670_s21, 128  }
 0x172   :  { %v1580_v8 = vld [vmem:[%s1978_s2 + $0x78] sm:$0xff] (%p667_p12)   ;;  %v1582_v9 = vld [vmem:[%s1978_s2 + $0x70] sm:$0xff] (%p667_p12)   ;;  %v1585_v12 = vld [vmem:[%s1978_s2 + $0x68] sm:$0xff] (%p667_p12)  }
 0x173   :  { %669 = sbr.rel (!%p667_p12) target bundleno = 367 (0x16f), region = 177  ;;  %v1581_v40 = vld [vmem:[%s1978_s2 + $0x38] sm:$0xff] (%p667_p12)   ;;  %1379 = vmatprep.subr.bf16.mxu1 (%p667_p12), %v1580_v8  ;;  %v1584_v11 = vld [vmem:[%s1978_s2 + $0x30] sm:$0xff] (%p667_p12)   ;;  %v1587_v14 = vld [vmem:[%s1978_s2 + $0x28] sm:$0xff] (%p667_p12)  }
 0x174   :  { %1380 = vmatpush3.bf16.msra.mxu1 (%p667_p12), %v1581_v40  ;;  %v1583_v10 = vld [vmem:[%s1978_s2 + $0xb8] sm:$0xff] (%p667_p12)   ;;  %v1586_v13 = vld [vmem:[%s1978_s2 + $0xb0] sm:$0xff] (%p667_p12)   ;;  %v1588_v15 = vld [vmem:[%s1978_s2 + $0x60] sm:$0xff] (%p667_p12)  }
 0x175   :  { %1381 = vmatprep.subr.bf16.mxu1 (%p667_p12), %v1582_v9  ;;  %1491 = vmatprep.subr.bf16.mxu0 (%p667_p12), %v1583_v10  ;;  %v1589_v16 = vld [vmem:[%s1978_s2 + $0xa8] sm:$0xff] (%p667_p12)   ;;  %v1590_v17 = vld [vmem:[%s1978_s2 + $0x20] sm:$0xff] (%p667_p12)   ;;  %v1591_v18 = vld [vmem:[%s1978_s2 + $0x58] sm:$0xff] (%p667_p12)  }
 0x176   :  { %1492 = vmatpush3.bf16.msra.mxu0 (%p667_p12), %v1583_v10  ;;  %v1592_v19 = vld [vmem:[%s1978_s2 + $0xa0] sm:$0xff] (%p667_p12)   ;;  %v1593_v20 = vld [vmem:[%s1978_s2 + $0x18] sm:$0xff] (%p667_p12)   ;;  %v1594_v22 = vld [vmem:[%s1978_s2 + $0x50] sm:$0xff] (%p667_p12)  }
 0x177   :  { %1493 = vmatprep.subr.bf16.mxu0 (%p667_p12), %v1586_v13  ;;  %v1595_v21 = vld [vmem:[%s1978_s2 + $0x98] sm:$0xff] (%p667_p12)   ;;  %v1596_v23 = vld [vmem:[%s1978_s2 + $0x10] sm:$0xff] (%p667_p12)   ;;  %v1597_v25 = vld [vmem:[%s1978_s2 + $0x48] sm:$0xff] (%p667_p12)  }
 0x178   :  { %1382 = vmatpush3.bf16.msra.mxu1 %v1584_v11  ;;  %v1598_v24 = vld [vmem:[%s1978_s2 + $0x90] sm:$0xff]   ;;  %v1599_v26 = vld [vmem:[%s1978_s2 + $0x8] sm:$0xff]   ;;  %v679_v29 = vld [vmem:[#allocation2 + $0x1a0] sm:$0xff] }
 0x179   :  { %1383 = vmatprep.subr.bf16.mxu1 %v1585_v12  ;;  %v1601_v27 = vld [vmem:[%s1978_s2 + $0x88] sm:$0xff]   ;;  %v1600_v30 = vld [vmem:[%s1978_s2 + $0x40] sm:$0xff]   ;;  %v677_v32 = vld [vmem:[#allocation2 + $0x190] sm:$0xff] }
 0x17a   :  { %1494 = vmatpush3.bf16.msra.mxu0 %v1586_v13  ;;  %v676_v28 = vld [vmem:[#allocation2 + $0x188] sm:$0xff]  ;;  %v1602_v34 = vld [vmem:[%s1978_s2] sm:$0xff]   ;;  %v678_v37 = vld [vmem:[#allocation2 + $0x198] sm:$0xff] }
 0x17b   :  { %1495 = vmatprep.subr.bf16.mxu0 %v1589_v16  ;;  %v724_v31 = vpack.c.bf16 %v679_v29, %v676_v28  ;;  %v680_v33 = vld [vmem:[#allocation2 + $0x1a8] sm:$0xff]  ;;  %v675_v36 = vld [vmem:[#allocation2 + $0x180] sm:$0xff]  ;;  %v682_v39 = vld [vmem:[#allocation2 + $0x1b8] sm:$0xff] }
 0x17c   :  { %1384 = vmatpush3.bf16.msra.mxu1 %v1587_v14  ;;  %v725_v35 = vpack.c.bf16 %v680_v33, %v677_v32  ;;  %v1603_v38 = vld [vmem:[%s1978_s2 + $0x80] sm:$0xff]   ;;  %v685_v41 = vld [vmem:[#allocation2 + $0x1d0] sm:$0xff]  ;;  %v723_v42 = vpack.c.bf16 %v678_v37, %v675_v36  ;;  %v686_v44 = vld [vmem:[#allocation2 + $0x1d8] sm:$0xff] }
 0x17d   :  { %1385 = vmatprep.subr.bf16.mxu1 %v1588_v15  ;;  %978 = vmatprep.mubr.bf16.mxu1 %v724_v31  ;;  %v683_v43 = vld [vmem:[#allocation2 + $0x1c0] sm:$0xff]  ;;  %v727_v45 = vpack.c.bf16 %v685_v41, %v682_v39  ;;  %v689_v46 = vld [vmem:[#allocation2 + $0x1f0] sm:$0xff]  ;;  %v692_v47 = vld [vmem:[#allocation2 + $0x208] sm:$0xff] }
 0x17e   :  { %1496 = vmatpush3.bf16.msra.mxu0 %v1589_v16  ;;  %1507 = vmatprep.mubr.bf16.mxu0 %v725_v35  ;;  %v728_v48 = vpack.c.bf16 %v686_v44, %v683_v43  ;;  %v731_v49 = vpack.c.bf16 %v692_v47, %v689_v46  ;;  %v681_v50 = vld [vmem:[#allocation2 + $0x1b0] sm:$0xff]  ;;  %v684_v51 = vld [vmem:[#allocation2 + $0x1c8] sm:$0xff]  ;;  %v691_v53 = vld [vmem:[#allocation2 + $0x200] sm:$0xff] }
 0x17f   :  { %1497 = vmatprep.subr.bf16.mxu0 %v1592_v19  ;;  %v688_v52 = vld [vmem:[#allocation2 + $0x1e8] sm:$0xff]  ;;  %v726_v54 = vpack.c.bf16 %v684_v51, %v681_v50  ;;  %v695_v55 = vld [vmem:[#allocation2 + $0x220] sm:$0xff]  ;;  %v698_v56 = vld [vmem:[#allocation2 + $0x238] sm:$0xff] }
 0x180   :  { %1386 = vmatpush3.bf16.msra.mxu1 %v1590_v17  ;;  %v730_v57 = vpack.c.bf16 %v691_v53, %v688_v52  ;;  %v701_v58 = vld [vmem:[#allocation2 + $0x250] sm:$0xff]  ;;  %v704_v59 = vld [vmem:[#allocation2 + $0x268] sm:$0xff]  ;;  %v734_v60 = vpack.c.bf16 %v698_v56, %v695_v55  ;;  %v687_v62 = vld [vmem:[#allocation2 + $0x1e0] sm:$0xff] }
 0x181   :  { %1387 = vmatprep.subr.bf16.mxu1 %v1591_v18  ;;  %v737_v61 = vpack.c.bf16 %v704_v59, %v701_v58  ;;  %v690_v63 = vld [vmem:[#allocation2 + $0x1f8] sm:$0xff]  ;;  %v697_v1 = vld [vmem:[#allocation2 + $0x230] sm:$0xff]  ;;  %v707_v3 = vld [vmem:[#allocation2 + $0x280] sm:$0xff] }
 0x182   :  { %1498 = vmatpush3.bf16.msra.mxu0 %v1592_v19  ;;  %v694_v0 = vld [vmem:[#allocation2 + $0x218] sm:$0xff]  ;;  %v729_v2 = vpack.c.bf16 %v690_v63, %v687_v62  ;;  %v713_v6 = vld [vmem:[#allocation2 + $0x2b0] sm:$0xff]  ;;  %v716_v7 = vld [vmem:[#allocation2 + $0x2c8] sm:$0xff] }
 0x183   :  { %1499 = vmatprep.subr.bf16.mxu0 %v1595_v21  ;;  %v710_v4 = vld [vmem:[#allocation2 + $0x298] sm:$0xff]  ;;  %v733_v5 = vpack.c.bf16 %v697_v1, %v694_v0  ;;  %v743_v40 = vpack.c.bf16 %v716_v7, %v713_v6  ;;  %v693_v9 = vld [vmem:[#allocation2 + $0x210] sm:$0xff]  ;;  %v696_v10 = vld [vmem:[#allocation2 + $0x228] sm:$0xff] }
 0x184   :  { %1388 = vmatpush3.bf16.msra.mxu1 %v1593_v20  ;;  %v740_v8 = vpack.c.bf16 %v710_v4, %v707_v3  ;;  %v700_v11 = vld [vmem:[#allocation2 + $0x248] sm:$0xff]  ;;  %v703_v12 = vld [vmem:[#allocation2 + $0x260] sm:$0xff]  ;;  %v732_v13 = vpack.c.bf16 %v696_v10, %v693_v9  ;;  %v722_v15 = vld [vmem:[#allocation2 + $0x2f8] sm:$0xff] }
 0x185   :  { %1389 = vmatprep.subr.bf16.mxu1 %v1594_v22  ;;  %v719_v14 = vld [vmem:[#allocation2 + $0x2e0] sm:$0xff]  ;;  %v736_v16 = vpack.c.bf16 %v703_v12, %v700_v11  ;;  %v702_v19 = vld [vmem:[#allocation2 + $0x258] sm:$0xff]  ;;  %v721_v33 = vld [vmem:[#allocation2 + $0x2f0] sm:$0xff] }
 0x186   :  { %1500 = vmatpush3.bf16.msra.mxu0 %v1595_v21  ;;  %v746_v17 = vpack.c.bf16 %v722_v15, %v719_v14  ;;  %v699_v18 = vld [vmem:[#allocation2 + $0x240] sm:$0xff]  ;;  %v706_v20 = vld [vmem:[#allocation2 + $0x278] sm:$0xff]  ;;  %v709_v21 = vld [vmem:[#allocation2 + $0x290] sm:$0xff] }
 0x187   :  { %1501 = vmatprep.subr.bf16.mxu0 %v1598_v24  ;;  %v735_v22 = vpack.c.bf16 %v702_v19, %v699_v18  ;;  %v714_v31 = vld [vmem:[#allocation2 + $0x2b8] sm:$0xff]  ;;  %v717_v36 = vld [vmem:[#allocation2 + $0x2d0] sm:$0xff]  ;;  %v720_v37 = vld [vmem:[#allocation2 + $0x2e8] sm:$0xff] }
 0x188   :  { %1390 = vmatpush3.bf16.msra.mxu1 %v1596_v23  ;;  %v739_v23 = vpack.c.bf16 %v709_v21, %v706_v20  ;;  %v718_v32 = vld [vmem:[#allocation2 + $0x2d8] sm:$0xff] }
 0x189   :  { %1391 = vmatprep.subr.bf16.mxu1 %v1597_v25  ;;  %v708_v25 = vld [vmem:[#allocation2 + $0x288] sm:$0xff]  ;;  %v745_v35 = vpack.c.bf16 %v721_v33, %v718_v32 }
 0x18a   :  { %1502 = vmatpush3.bf16.msra.mxu0 %v1598_v24  ;;  %v705_v24 = vld [vmem:[#allocation2 + $0x270] sm:$0xff] }
 0x18b   :  { %1503 = vmatprep.subr.bf16.mxu0 %v1601_v27  ;;  %v738_v28 = vpack.c.bf16 %v708_v25, %v705_v24 }
 0x18c   :  { %1392 = vmatpush3.bf16.msra.mxu1 %v1599_v26  ;;  %v712_v26 = vld [vmem:[#allocation2 + $0x2a8] sm:$0xff] }
 0x18d   :  { %1393 = vmatprep.subr.bf16.mxu1 %v1600_v30  ;;  %v711_v30 = vld [vmem:[#allocation2 + $0x2a0] sm:$0xff] }
 0x18e   :  { %1504 = vmatpush3.bf16.msra.mxu0 %v1601_v27  ;;  %v715_v27 = vld [vmem:[#allocation2 + $0x2c0] sm:$0xff] }
 0x18f   :  { %1505 = vmatprep.subr.bf16.mxu0 %v1603_v38  ;;  %v742_v29 = vpack.c.bf16 %v715_v27, %v712_v26 }
 0x190   :  { %1394 = vmatpush3.bf16.msra.mxu1 %v1602_v34  ;;  %v741_v34 = vpack.c.bf16 %v714_v31, %v711_v30 }
 0x192   :  { %1506 = vmatpush3.bf16.msra.mxu0 %v1603_v38  ;;  %v744_v38 = vpack.c.bf16 %v720_v37, %v717_v36 }
 0x193   :  { %979 = vmatmul.mubr.bf16.vlgmr.msra.gmra.mxu1 %v723_v42  ;;  %v1910_v42 = vld [vmem:[%s1979_s3] ss:$0 sm:$0xff] }
 0x194   :  { %986 = vmatprep.mubr.bf16.mxu1 %v727_v45 }
 0x195   :  { %1508 = vmatmul.mubr.bf16.vlgmr.msra.gmra.mxu0 %v728_v48 }
 0x196   :  { %1511 = vmatprep.mubr.bf16.mxu0 %v731_v49 }
 0x19b   :  { %987 = vmatmul.mubr.bf16.gmra.mxu1 %v726_v54 }
 0x19c   :  { %994 = vmatprep.mubr.bf16.mxu1 %v730_v57 }
 0x19d   :  { %1512 = vmatmul.mubr.bf16.gmra.mxu0 %v734_v60 }
 0x19e   :  { %1515 = vmatprep.mubr.bf16.mxu0 %v737_v61 }
 0x1a3   :  { %995 = vmatmul.mubr.bf16.gmra.mxu1 %v729_v2 }
 0x1a4   :  { %1002 = vmatprep.mubr.bf16.mxu1 %v733_v5 }
 0x1a5   :  { %1516 = vmatmul.mubr.bf16.gmra.mxu0 %v740_v8 }
 0x1a6   :  { %1519 = vmatprep.mubr.bf16.mxu0 %v743_v40 }
 0x1ab   :  { %1003 = vmatmul.mubr.bf16.gmra.mxu1 %v732_v13 }
 0x1ac   :  { %1010 = vmatprep.mubr.bf16.mxu1 %v736_v16 }
 0x1ad   :  { %1520 = vmatmul.mubr.bf16.gmra.mxu0 %v746_v17 }
 0x1b3   :  { %1011 = vmatmul.mubr.bf16.gmra.mxu1 %v735_v22 }
 0x1b4   :  { %1018 = vmatprep.mubr.bf16.mxu1 %v739_v23 }
 0x1bb   :  { %1019 = vmatmul.mubr.bf16.gmra.mxu1 %v738_v28 }
 0x1bc   :  { %1026 = vmatprep.mubr.bf16.mxu1 %v742_v29 }
 0x1c3   :  { %1027 = vmatmul.mubr.bf16.gmra.mxu1 %v741_v34 }
 0x1c4   :  { %1034 = vmatprep.mubr.bf16.mxu1 %v745_v35 }
 0x1cb   :  { %1035 = vmatmul.mubr.bf16.gmra.mxu1 %v744_v38 }
 0x253   :  { %v1395_v39 = vpop.f32.mrf.mxu1 }
 0x255   :  { %v1396_v41 = vpop.f32.mrf.mxu1  ;;  %v1509_v44 = vpop.f32.mrf.mxu0 }
 0x256   :  { %v1397_v43 = vadd.f32 %v1396_v41, %v1395_v39 }
 0x257   :  { %v1398_v45 = vpop.f32.mrf.mxu1  ;;  %v1077_v47 = vpop.f32.mrf.mxu0 }
 0x258   :  { %v981_v46 = vadd.f32 %v1397_v43, %v1910_v42 }
 0x259   :  { %v1399_v48 = vpop.f32.mrf.mxu1  ;;  %v1510_v51 = vpop.f32.mrf.mxu0 }
 0x25a   :  { %v1400_v49 = vadd.f32 %v1399_v48, %v1398_v45  ;;  %v1078_v50 = vadd.f32 %v1077_v47, %v981_v46 }
 0x25b   :  { %v1401_v52 = vpop.f32.mrf.mxu1  ;;  %v1080_v54 = vpop.f32.mrf.mxu0 }
 0x25c   :  { %1140 = vst [vmem:[%s1980_s4 + $0x80] sm:$0xff] %v1078_v50  ;;  %v984_v53 = vadd.f32 %v1400_v49, %v1910_v42 }
 0x25d   :  { %v1402_v55 = vpop.f32.mrf.mxu1  ;;  %v1513_v59 = vpop.f32.mrf.mxu0 }
 0x25e   :  { %v1403_v56 = vadd.f32 %v1402_v55, %v1401_v52  ;;  %v1081_v57 = vadd.f32 %v1080_v54, %v984_v53 }
 0x25f   :  { %v1404_v58 = vpop.f32.mrf.mxu1  ;;  %v1093_v1 = vpop.f32.mrf.mxu0 }
 0x260   :  { %v989_v60 = vadd.f32 %v1403_v56, %v1910_v42  ;;  %1141 = vst [vmem:[%s1980_s4 + $0x88] sm:$0xff] %v1081_v57 }
 0x261   :  { %v1405_v61 = vpop.f32.mrf.mxu1  ;;  %v1514_v7 = vpop.f32.mrf.mxu0 }
 0x262   :  { %v1086_v62 = vadd.f32 %v1509_v44, %v989_v60  ;;  %v1406_v63 = vadd.f32 %v1405_v61, %v1404_v58 }
 0x263   :  { %v1407_v0 = vpop.f32.mrf.mxu1  ;;  %v1096_v12 = vpop.f32.mrf.mxu0 }
 0x264   :  { %1142 = vst [vmem:[%s1980_s4 + $0x90] sm:$0xff] %v1086_v62  ;;  %v992_v2 = vadd.f32 %v1406_v63, %v1910_v42 }
 0x265   :  { %v1408_v3 = vpop.f32.mrf.mxu1  ;;  %v1517_v18 = vpop.f32.mrf.mxu0 }
 0x266   :  { %v1089_v4 = vadd.f32 %v1510_v51, %v992_v2  ;;  %v1409_v5 = vadd.f32 %v1408_v3, %v1407_v0 }
 0x267   :  { %v1410_v6 = vpop.f32.mrf.mxu1  ;;  %v1109_v24 = vpop.f32.mrf.mxu0 }
 0x268   :  { %1143 = vst [vmem:[%s1980_s4 + $0x98] sm:$0xff] %v1089_v4  ;;  %v997_v8 = vadd.f32 %v1409_v5, %v1910_v42 }
 0x269   :  { %v1411_v40 = vpop.f32.mrf.mxu1  ;;  %v1518_v30 = vpop.f32.mrf.mxu0 }
 0x26a   :  { %v1412_v9 = vadd.f32 %v1411_v40, %v1410_v6  ;;  %v1094_v10 = vadd.f32 %v1093_v1, %v997_v8 }
 0x26b   :  { %v1413_v11 = vpop.f32.mrf.mxu1  ;;  %v1112_v36 = vpop.f32.mrf.mxu0 }
 0x26c   :  { %1144 = vst [vmem:[%s1980_s4 + $0xa0] sm:$0xff] %v1094_v10  ;;  %v1000_v13 = vadd.f32 %v1412_v9, %v1910_v42 }
 0x26d   :  { %v1414_v14 = vpop.f32.mrf.mxu1  ;;  %v1521_v44 = vpop.f32.mrf.mxu0 }
 0x26e   :  { %v1415_v15 = vadd.f32 %v1414_v14, %v1413_v11  ;;  %v1097_v16 = vadd.f32 %v1096_v12, %v1000_v13 }
 0x26f   :  { %v1416_v17 = vpop.f32.mrf.mxu1  ;;  %v1125_v50 = vpop.f32.mrf.mxu0 }
 0x270   :  { %v1005_v19 = vadd.f32 %v1415_v15, %v1910_v42  ;;  %1145 = vst [vmem:[%s1980_s4 + $0xa8] sm:$0xff] %v1097_v16 }
 0x271   :  { %v1417_v20 = vpop.f32.mrf.mxu1  ;;  %v1522_v56 = vpop.f32.mrf.mxu0 }
 0x272   :  { %v1102_v21 = vadd.f32 %v1513_v59, %v1005_v19  ;;  %v1418_v22 = vadd.f32 %v1417_v20, %v1416_v17 }
 0x273   :  { %v1419_v23 = vpop.f32.mrf.mxu1  ;;  %v1128_v62 = vpop.f32.mrf.mxu0 }
 0x274   :  { %1146 = vst [vmem:[%s1980_s4 + $0xb0] sm:$0xff] %v1102_v21  ;;  %v1008_v25 = vadd.f32 %v1418_v22, %v1910_v42 }
 0x275   :  { %v1420_v26 = vpop.f32.mrf.mxu1 }
 0x276   :  { %v1105_v27 = vadd.f32 %v1514_v7, %v1008_v25  ;;  %v1421_v28 = vadd.f32 %v1420_v26, %v1419_v23 }
 0x277   :  { %v1422_v29 = vpop.f32.mrf.mxu1 }
 0x278   :  { %1147 = vst [vmem:[%s1980_s4 + $0xb8] sm:$0xff] %v1105_v27  ;;  %v1013_v31 = vadd.f32 %v1421_v28, %v1910_v42 }
 0x279   :  { %v1423_v32 = vpop.f32.mrf.mxu1 }
 0x27a   :  { %v1424_v33 = vadd.f32 %v1423_v32, %v1422_v29  ;;  %v1110_v34 = vadd.f32 %v1109_v24, %v1013_v31 }
 0x27b   :  { %v1425_v35 = vpop.f32.mrf.mxu1 }
 0x27c   :  { %1148 = vst [vmem:[%s1980_s4 + $0xc0] sm:$0xff] %v1110_v34  ;;  %v1016_v37 = vadd.f32 %v1424_v33, %v1910_v42 }
 0x27d   :  { %v1426_v38 = vpop.f32.mrf.mxu1 }
 0x27e   :  { %v1427_v39 = vadd.f32 %v1426_v38, %v1425_v35  ;;  %v1113_v41 = vadd.f32 %v1112_v36, %v1016_v37 }
 0x27f   :  { %v1428_v43 = vpop.f32.mrf.mxu1 }
 0x280   :  { %v1021_v45 = vadd.f32 %v1427_v39, %v1910_v42  ;;  %1149 = vst [vmem:[%s1980_s4 + $0xc8] sm:$0xff] %v1113_v41 }
 0x281   :  { %v1429_v46 = vpop.f32.mrf.mxu1 }
 0x282   :  { %v1118_v47 = vadd.f32 %v1517_v18, %v1021_v45  ;;  %v1430_v48 = vadd.f32 %v1429_v46, %v1428_v43 }
 0x283   :  { %v1431_v49 = vpop.f32.mrf.mxu1 }
 0x284   :  { %1150 = vst [vmem:[%s1980_s4 + $0xd0] sm:$0xff] %v1118_v47  ;;  %v1024_v51 = vadd.f32 %v1430_v48, %v1910_v42 }
 0x285   :  { %v1432_v52 = vpop.f32.mrf.mxu1 }
 0x286   :  { %v1121_v53 = vadd.f32 %v1518_v30, %v1024_v51  ;;  %v1433_v54 = vadd.f32 %v1432_v52, %v1431_v49 }
 0x287   :  { %v1434_v55 = vpop.f32.mrf.mxu1 }
 0x288   :  { %1151 = vst [vmem:[%s1980_s4 + $0xd8] sm:$0xff] %v1121_v53  ;;  %v1029_v57 = vadd.f32 %v1433_v54, %v1910_v42 }
 0x289   :  { %v1435_v58 = vpop.f32.mrf.mxu1 }
 0x28a   :  { %v1436_v59 = vadd.f32 %v1435_v58, %v1434_v55  ;;  %v1126_v60 = vadd.f32 %v1125_v50, %v1029_v57 }
 0x28b   :  { %v1437_v61 = vpop.f32.mrf.mxu1 }
 0x28c   :  { %1152 = vst [vmem:[%s1980_s4 + $0xe0] sm:$0xff] %v1126_v60  ;;  %v1032_v63 = vadd.f32 %v1436_v59, %v1910_v42 }
 0x28d   :  { %v1438_v0 = vpop.f32.mrf.mxu1 }
 0x28e   :  { %v1439_v1 = vadd.f32 %v1438_v0, %v1437_v61  ;;  %v1129_v2 = vadd.f32 %v1128_v62, %v1032_v63 }
 0x28f   :  { %v1440_v3 = vpop.f32.mrf.mxu1 }
 0x290   :  { %v1037_v4 = vadd.f32 %v1439_v1, %v1910_v42  ;;  %1153 = vst [vmem:[%s1980_s4 + $0xe8] sm:$0xff] %v1129_v2 }
 0x291   :  { %v1441_v5 = vpop.f32.mrf.mxu1 }
 0x292   :  { %v1134_v6 = vadd.f32 %v1521_v44, %v1037_v4  ;;  %v1442_v7 = vadd.f32 %v1441_v5, %v1440_v3 }
 0x294   :  { %1154 = vst [vmem:[%s1980_s4 + $0xf0] sm:$0xff] %v1134_v6  ;;  %v1040_v8 = vadd.f32 %v1442_v7, %v1910_v42 }
 0x296   :  { %v1137_v40 = vadd.f32 %v1522_v56, %v1040_v8 }
 0x298   :  { %1155 = vst [vmem:[%s1980_s4 + $0xf8] sm:$0xff] %v1137_v40 }
 0x299   :  { %1160 = vsyncmov [#allocation3] }
 0x29c   :  { %s1161_s3 = vpop.sfrf %1160 }
 0x29d   :  { %p1293_p13 = scmp.ne.s32.totalorder %s1161_s3, 0 }
 0x29f   :  { %1165 = shalt.err (%p1293_p13)  }
 0x2a0   :  { %1167 = vsyncmov [#allocation3 + $0x1] }
 0x2a3   :  { %s1168_s17 = vpop.sfrf %1167 }
 0x2a4   :  { %p1294_p0 = scmp.ne.s32.totalorder %s1168_s17, 0 }
 0x2a6   :  { %1172 = shalt.err (%p1294_p0)  }

</bundles_post_ra>
